<compile_context>
chip_gen: v7x
topology: tpu7x:2x2x1
jax: 0.10.0
libtpu: 0.0.40
codegen_flags: <defaults>
</compile_context>

<pallas_src>
import numpy as np
import jax
import jax.numpy as jnp
from jax import lax
from jax.experimental import pallas as pl
from jax.experimental.pallas import tpu as pltpu


def _lm_head_calib_kernel(nts_ref, h_ref, w_lm_ref, b_lm_ref, gamma_ref, out_ref):
    # nts_ref:   [1]        int32 (SMEM, scalar prefetch)
    # h_ref:     [tm, H]    bf16 (or f32)   -- same dtype as w_lm_ref
    # w_lm_ref:  [H,  tn]   bf16 (or f32)
    # b_lm_ref:  [1,  tn]   f32
    # gamma_ref: [tm, 1]    f32             -- precomputed calibration factor
    # out_ref:   [tm, tn]
    tm, tn = out_ref.shape
    j = pl.program_id(1)
    col0 = j * tn
    nts = nts_ref[0]

    # lm_head matmul on the MXU (bf16 operands, f32 accumulation).
    logits = jnp.dot(h_ref[...], w_lm_ref[...],
                     preferred_element_type=jnp.float32)
    logits = logits + b_lm_ref[...]                          # [tm, tn] f32

    gamma = gamma_ref[...]                                   # [tm, 1]  f32

    # Tile-level predication on the calibration boundary.
    @pl.when(col0 + tn <= nts)                # tile entirely before boundary
    def _():
        out_ref[...] = logits.astype(out_ref.dtype)

    @pl.when(col0 >= nts)                     # tile entirely after boundary
    def _():
        out_ref[...] = (logits * gamma).astype(out_ref.dtype)

    @pl.when((col0 < nts) & (col0 + tn > nts))   # the single boundary tile
    def _():
        col_ids = col0 + lax.broadcasted_iota(jnp.int32, (tm, tn), 1)
        scale = jnp.where(col_ids >= nts, gamma, jnp.float32(1.0))
        out_ref[...] = (logits * scale).astype(out_ref.dtype)


def _tpu_tile_defaults():
    """(tm, tn, vmem_limit_bytes) per TPU generation."""
    try:
        kind = jax.devices()[0].device_kind.lower()
    except Exception:  # pragma: no cover
        kind = ""
    if "v7" in kind:
        # 64 MiB physical VMEM per TC: leave headroom for compiler scratch.
        return 512, 512, 56 * 1024 * 1024
    if "v6" in kind:
        # 128 MiB VMEM, ~640 flop/byte crossover -> big row tiles.
        return 1024, 512, 100 * 1024 * 1024
    if "v5" in kind:
        # v5e crossover ~240 flop/byte; tm=256 already compute-balanced.
        return 256, 512, 96 * 1024 * 1024
    return 256, 512, 64 * 1024 * 1024


def prepare_calibration_weights(w_lm, b_lm, w_cal, b_cal, use_bf16=True):
    """One-time weight prep (hoist out of the per-call hot path).

    Returns (w_lm_mm [H,V] mm_dtype, b_lm2 [1,V] f32, w_eff [H,1] f32,
             b_eff [1,1] f32)."""
    mm_dtype = jnp.bfloat16 if use_bf16 else jnp.float32
    w_lm_mm = w_lm.astype(mm_dtype)
    b_lm2 = b_lm.reshape(1, -1).astype(jnp.float32)
    # bf16 matvec with f32 accumulation: avoids materializing an f32 copy of W.
    w_eff = jnp.dot(w_lm_mm, w_cal.astype(mm_dtype),
                    preferred_element_type=jnp.float32)             # [H, 1]
    b_eff = (jnp.dot(b_lm.astype(jnp.float32), w_cal.astype(jnp.float32))
             + b_cal.astype(jnp.float32)).reshape(1, 1)             # [1, 1]
    return w_lm_mm, b_lm2, w_eff, b_eff


def lm_head_with_logits_calibration(h, w_lm, b_lm, w_cal, b_cal,
                                    new_tokens_start_i, *,
                                    prepared=None,
                                    tm=None, tn=None,
                                    use_bf16=True, out_dtype=None,
                                    vmem_limit_bytes=None,
                                    weight_buffers=None):
    """h: [B, S, H]. w_lm: [H, V], b_lm: [V], w_cal: [V, 1], b_cal: [1].
    Returns calibrated logits [B, S, V].

    `prepared`: output of prepare_calibration_weights() to hoist weight
    conversion/folding out of the per-call path (recommended for decode)."""
    B, S, H = h.shape
    V = w_lm.shape[1]
    M = B * S
    out_dtype = h.dtype if out_dtype is None else out_dtype

    if prepared is None:
        prepared = prepare_calibration_weights(w_lm, b_lm, w_cal, b_cal, use_bf16)
    w_lm_mm, b_lm2, w_eff, b_eff = prepared
    mm_dtype = w_lm_mm.dtype

    # gamma precomputed exactly in f32 from f32 h (tiny [M,H]@[H,1] matvec).
    h_f32 = h.reshape(M, H).astype(jnp.float32)
    gamma = (h_f32 @ w_eff + b_eff).astype(jnp.float32)              # [M, 1]

    # h streamed to the kernel in the matmul dtype (bf16 halves HBM/VMEM).
    h2 = h.reshape(M, H).astype(mm_dtype)

    # Tile sizes / VMEM limit: per-generation defaults, overridable.
    tm_d, tn_d, vmem_d = _tpu_tile_defaults()
    tm = tm_d if tm is None else tm
    tn = tn_d if tn is None else tn
    vmem_limit_bytes = vmem_d if vmem_limit_bytes is None else vmem_limit_bytes

    # Clamp to array extents and to (8, 128) layout multiples.
    tm = min(tm, M)
    tn = min(tn, V)
    if tm < M:
        tm = max(8, (tm // 8) * 8)
    if tn < V:
        tn = max(128, (tn // 128) * 128)

    grid = (pl.cdiv(M, tm), pl.cdiv(V, tn))

    # Normalize new_tokens_start_i (Python-slicing semantics for static ints,
    # clamp to [0, V] so a bad value degrades gracefully, never OOB).
    if isinstance(new_tokens_start_i, (int, np.integer)):
        nts_i = int(new_tokens_start_i)
        if nts_i < 0:
            nts_i += V
        nts_i = min(max(nts_i, 0), V)
        nts = jnp.asarray([nts_i], dtype=jnp.int32)
    else:
        nts = jnp.clip(jnp.asarray(new_tokens_start_i, jnp.int32).reshape(1),
                       0, V)

    # Megacore split: if there is a single row tile (decode), make the vocab
    # axis the parallel one so both TensorCores stream disjoint halves of W.
    if grid[0] == 1:
        dim_sem = ("arbitrary", "parallel")
    else:
        dim_sem = ("parallel", "parallel")

    w_spec = pl.BlockSpec((H, tn), lambda i, j, nts_ref: (0, j))
    if weight_buffers is not None:
        # Optional deeper pipelining of the weight stream (v5e/v6e only).
        w_spec = pl.BlockSpec((H, tn), lambda i, j, nts_ref: (0, j),
                              pipeline_mode=pl.Buffered(weight_buffers))

    out_itemsize = jnp.dtype(out_dtype).itemsize
    mm_itemsize = jnp.dtype(mm_dtype).itemsize
    cost = pl.CostEstimate(
        flops=2 * M * H * V,
        transcendentals=0,
        # W is re-streamed once per row tile; h once; logits written once.
        bytes_accessed=(M * H * mm_itemsize
                        + H * V * mm_itemsize * grid[0]
                        + V * 4 + M * 4
                        + M * V * out_itemsize),
    )

    out = pl.pallas_call(
        _lm_head_calib_kernel,
        out_shape=jax.ShapeDtypeStruct((M, V), out_dtype),
        grid_spec=pltpu.PrefetchScalarGridSpec(
            num_scalar_prefetch=1,
            grid=grid,
            in_specs=[
                pl.BlockSpec((tm, H), lambda i, j, nts_ref: (i, 0)),   # h rows
                w_spec,                                                # w_lm tile
                pl.BlockSpec((1, tn), lambda i, j, nts_ref: (0, j)),   # b_lm tile
                pl.BlockSpec((tm, 1), lambda i, j, nts_ref: (i, 0)),   # gamma
            ],
            out_specs=pl.BlockSpec((tm, tn), lambda i, j, nts_ref: (i, j)),
        ),
        compiler_params=pltpu.CompilerParams(
            dimension_semantics=dim_sem,
            vmem_limit_bytes=vmem_limit_bytes,
        ),
        cost_estimate=cost,
    )(nts, h2, w_lm_mm, b_lm2, gamma)

    return out.reshape(B, S, V).astype(out_dtype)


def reference(h, w_lm, b_lm, w_cal, b_cal, new_tokens_start_i):
    logits = jnp.einsum("bsh,hv->bsv", h, w_lm) + b_lm
    gamma = jnp.einsum("bsv,vo->bso", logits, w_cal) + b_cal  # [..., 1]
    tail = logits[..., new_tokens_start_i:] * gamma
    return jnp.concatenate([logits[..., :new_tokens_start_i], tail], axis=-1)


def _make_inputs(key, B, S, H, V):
    k_h, k_wlm, k_blm, k_wcal, k_bcal = jax.random.split(key, 5)
    h = jax.random.normal(k_h, (B, S, H), dtype=jnp.float32)
    w_lm = jax.random.normal(k_wlm, (H, V), dtype=jnp.float32) * 0.05
    b_lm = jax.random.normal(k_blm, (V,), dtype=jnp.float32) * 0.05
    w_cal = jax.random.normal(k_wcal, (V, 1), dtype=jnp.float32) * 0.05
    b_cal = jax.random.normal(k_bcal, (1,), dtype=jnp.float32) * 0.05
    return h, w_lm, b_lm, w_cal, b_cal


if __name__ == "__main__":
    key = jax.random.PRNGKey(0)
    k1, k2 = jax.random.split(key)

    # Test 1: single V tile containing the calibration boundary (boundary path),
    # with pre-hoisted weights (the recommended decode/serving path).
    B, S, H, V = 2, 8, 32, 256
    nts_i = 192
    h, w_lm, b_lm, w_cal, b_cal = _make_inputs(k1, B, S, H, V)
    prep = prepare_calibration_weights(w_lm, b_lm, w_cal, b_cal, use_bf16=True)
    out = lm_head_with_logits_calibration(h, w_lm, b_lm, w_cal, b_cal, nts_i,
                                          prepared=prep)
    out = jax.block_until_ready(out)
    ref = reference(h, w_lm, b_lm, w_cal, b_cal, nts_i)
    assert out.shape == (B, S, V)
    # bf16 MXU operands -> compare against f32 reference with bf16-level tol.
    assert jnp.allclose(out, ref, atol=2e-2, rtol=2e-2), "test1 mismatch"

    # Test 2: multiple row and vocab tiles; boundary aligned to the tile grid
    # so only the fully-before / fully-after branches run.
    B2, S2, H2, V2 = 2, 8, 32, 384
    nts_i2 = 256
    h2, w_lm2, b_lm2, w_cal2, b_cal2 = _make_inputs(k2, B2, S2, H2, V2)
    out2 = lm_head_with_logits_calibration(h2, w_lm2, b_lm2, w_cal2, b_cal2,
                                           nts_i2, tm=8, tn=128)
    out2 = jax.block_until_ready(out2)
    ref2 = reference(h2, w_lm2, b_lm2, w_cal2, b_cal2, nts_i2)
    assert out2.shape == (B2, S2, V2)
    assert jnp.allclose(out2, ref2, atol=2e-2, rtol=2e-2), "test2 mismatch"

    print("KERNEL_OK")
</pallas_src>

<mosaic_0001>
module attributes {stable_mosaic.version = 11 : i64} {
  func.func @_lm_head_calib_kernel(%arg0: i32, %arg1: i32, %arg2: memref<1xi32, #tpu.memory_space<smem>>, %arg3: memref<16x32xbf16, #tpu.memory_space<vmem>>, %arg4: memref<32x256xbf16, #tpu.memory_space<vmem>>, %arg5: memref<1x256xf32, #tpu.memory_space<vmem>>, %arg6: memref<16x1xf32, #tpu.memory_space<vmem>>, %arg7: memref<16x256xf32, #tpu.memory_space<vmem>>) attributes {dimension_semantics = [#tpu.dimension_semantics<arbitrary>, #tpu.dimension_semantics<parallel>], iteration_bounds = array<i64: 1, 1>, scalar_prefetch = 1 : i64, scratch_operands = 0 : i64, tpu.core_type = #tpu.core_type<tc>, window_params = [{transform_indices = @transform_0, window_bounds = array<i64: 16, 32>}, {transform_indices = @transform_1, window_bounds = array<i64: 32, 256>}, {transform_indices = @transform_2, window_bounds = array<i64: 1, 256>}, {transform_indices = @transform_3, window_bounds = array<i64: 16, 1>}, {transform_indices = @transform_4, window_bounds = array<i64: 16, 256>}]} {
    %c256_i32 = arith.constant 256 : i32
    %0 = arith.muli %arg1, %c256_i32 : i32
    %c0 = arith.constant 0 : index
    %1 = memref.load %arg2[%c0] : memref<1xi32, #tpu.memory_space<smem>>
    %c0_0 = arith.constant 0 : index
    %c0_1 = arith.constant 0 : index
    %2 = vector.load %arg3[%c0_0, %c0_1] : memref<16x32xbf16, #tpu.memory_space<vmem>>, vector<16x32xbf16>
    %c0_2 = arith.constant 0 : index
    %c0_3 = arith.constant 0 : index
    %3 = vector.load %arg4[%c0_2, %c0_3] : memref<32x256xbf16, #tpu.memory_space<vmem>>, vector<32x256xbf16>
    %cst = arith.constant dense<0.000000e+00> : vector<16x256xf32>
    %4 = tpu.matmul %2, %3, %cst {dimension_numbers = #tpu.dot_dimension_numbers<[1], [0], [0], [1], [0, 0, 1, 1], [], []>} : vector<16x32xbf16>, vector<32x256xbf16>, vector<16x256xf32> -> vector<16x256xf32>
    %c0_4 = arith.constant 0 : index
    %c0_5 = arith.constant 0 : index
    %5 = vector.load %arg5[%c0_4, %c0_5] : memref<1x256xf32, #tpu.memory_space<vmem>>, vector<1x256xf32>
    %6 = vector.broadcast %5 : vector<1x256xf32> to vector<16x256xf32>
    %7 = arith.addf %4, %6 : vector<16x256xf32>
    %c0_6 = arith.constant 0 : index
    %c0_7 = arith.constant 0 : index
    %8 = vector.load %arg6[%c0_6, %c0_7] : memref<16x1xf32, #tpu.memory_space<vmem>>, vector<16x1xf32>
    %c256_i32_8 = arith.constant 256 : i32
    %9 = arith.addi %0, %c256_i32_8 : i32
    %10 = arith.cmpi sle, %9, %1 : i32
    %11 = arith.extui %10 : i1 to i32
    %c0_i32 = arith.constant 0 : i32
    %12 = arith.cmpi ne, %11, %c0_i32 : i32
    scf.if %12 {
      %c0_12 = arith.constant 0 : index
      %c0_13 = arith.constant 0 : index
      %22 = vector.load %arg7[%c0_12, %c0_13] : memref<16x256xf32, #tpu.memory_space<vmem>>, vector<16x256xf32>
      tpu.vector_store %arg7[%c0_12, %c0_13], %7 {strides = array<i32>} : memref<16x256xf32, #tpu.memory_space<vmem>>, vector<16x256xf32>,
    } else {
    }
    %13 = arith.cmpi sge, %0, %1 : i32
    %14 = arith.extui %13 : i1 to i32
    %c0_i32_9 = arith.constant 0 : i32
    %15 = arith.cmpi ne, %14, %c0_i32_9 : i32
    scf.if %15 {
      %22 = vector.broadcast %8 : vector<16x1xf32> to vector<16x256xf32>
      %23 = arith.mulf %7, %22 : vector<16x256xf32>
      %c0_12 = arith.constant 0 : index
      %c0_13 = arith.constant 0 : index
      %24 = vector.load %arg7[%c0_12, %c0_13] : memref<16x256xf32, #tpu.memory_space<vmem>>, vector<16x256xf32>
      tpu.vector_store %arg7[%c0_12, %c0_13], %23 {strides = array<i32>} : memref<16x256xf32, #tpu.memory_space<vmem>>, vector<16x256xf32>,
    } else {
    }
    %16 = arith.cmpi slt, %0, %1 : i32
    %c256_i32_10 = arith.constant 256 : i32
    %17 = arith.addi %0, %c256_i32_10 : i32
    %18 = arith.cmpi sgt, %17, %1 : i32
    %19 = arith.andi %16, %18 : i1
    %20 = arith.extui %19 : i1 to i32
    %c0_i32_11 = arith.constant 0 : i32
    %21 = arith.cmpi ne, %20, %c0_i32_11 : i32
    scf.if %21 {
      %22 = tpu.iota {dimensions = array<i32: 1>} : vector<16x256xi32>
      %23 = vector.broadcast %0 : i32 to vector<16x256xi32>
      %24 = arith.addi %23, %22 : vector<16x256xi32>
      %25 = vector.broadcast %1 : i32 to vector<16x256xi32>
      %26 = arith.cmpi sge, %24, %25 : vector<16x256xi32>
      %cst_12 = arith.constant 1.000000e+00 : f32
      %27 = vector.shape_cast %8 : vector<16x1xf32> to vector<16x1xf32>
      %28 = vector.broadcast %27 : vector<16x1xf32> to vector<16x256xf32>
      %29 = vector.broadcast %cst_12 : f32 to vector<16x256xf32>
      %30 = arith.select %26, %28, %29 : vector<16x256xi1>, vector<16x256xf32>
      %31 = arith.mulf %7, %30 : vector<16x256xf32>
      %c0_13 = arith.constant 0 : index
      %c0_14 = arith.constant 0 : index
      %32 = vector.load %arg7[%c0_13, %c0_14] : memref<16x256xf32, #tpu.memory_space<vmem>>, vector<16x256xf32>
      tpu.vector_store %arg7[%c0_13, %c0_14], %31 {strides = array<i32>} : memref<16x256xf32, #tpu.memory_space<vmem>>, vector<16x256xf32>,
    } else {
    }
    return
  }
  func.func @transform_0(%arg0: i32, %arg1: i32, %arg2: memref<1xi32, #tpu.memory_space<smem>>) -> (i32, i32) {
    %c0_i32 = arith.constant 0 : i32
    %c0_i32_0 = arith.constant 0 : i32
    return %arg0, %c0_i32 : i32, i32
  }
  func.func @transform_1(%arg0: i32, %arg1: i32, %arg2: memref<1xi32, #tpu.memory_space<smem>>) -> (i32, i32) {
    %c0_i32 = arith.constant 0 : i32
    %c0_i32_0 = arith.constant 0 : i32
    return %c0_i32, %arg1 : i32, i32
  }
  func.func @transform_2(%arg0: i32, %arg1: i32, %arg2: memref<1xi32, #tpu.memory_space<smem>>) -> (i32, i32) {
    %c0_i32 = arith.constant 0 : i32
    %c0_i32_0 = arith.constant 0 : i32
    return %c0_i32, %arg1 : i32, i32
  }
  func.func @transform_3(%arg0: i32, %arg1: i32, %arg2: memref<1xi32, #tpu.memory_space<smem>>) -> (i32, i32) {
    %c0_i32 = arith.constant 0 : i32
    %c0_i32_0 = arith.constant 0 : i32
    return %arg0, %c0_i32 : i32, i32
  }
  func.func @transform_4(%arg0: i32, %arg1: i32, %arg2: memref<1xi32, #tpu.memory_space<smem>>) -> (i32, i32) {
    %c0_i32 = arith.constant 0 : i32
    return %arg0, %arg1 : i32, i32
  }
}

</mosaic_0001>

<bundles_post_ra>
// kernel: tpu_custom_call.1
= control target key start
LH: loop header
LB: loop body
LE: loop exit
PB: predicated region body
PF: predicated region fallthrough
CT: control target
= control target key end

     0   :  { %11 = vsyncpa [#allocation5], 0  ;;  %s550_s0 = inlined_call_operand.<no memory space> [shape: s32[1], index: 0, kind: input, shape index: {}]   ;;  %s551_s1 = inlined_call_operand.hbm [shape: bf16[16,32], index: 1, kind: input, shape index: {}]   ;;  %s552_s2 = inlined_call_operand.hbm [shape: bf16[32,256], index: 2, kind: input, shape index: {}]   ;;  %s553_s3 = inlined_call_operand.hbm [shape: f32[1,256], index: 3, kind: input, shape index: {}]   ;;  %s554_s4 = inlined_call_operand.hbm [shape: f32[16,1], index: 4, kind: input, shape index: {}]   ;;  %s555_s5 = inlined_call_operand.hbm [shape: f32[16,256], index: 5, kind: output, shape index: {}]  }
   0x1   :  { %12 = vsyncpa [#allocation8], 0 }
   0x2   :  { %13 = vsyncpa [#allocation11], 0 }
   0x3   :  { %14 = vsyncpa [#allocation6], 0  ;;  %s408_s18 = smov [#allocation7]   ;;  %s290_s22 = scalar_lea.hbm %s552_s2, 512 }
   0x4   :  { %s32_s19 = sshll.u32 %s408_s18, 4  ;;  %p291_p0 = scmp.ne.s32.totalorder %s552_s2, %s290_s22  ;;  %s33_s19 = int_to_ptr.vmem [resolvable:$true] %s32_s19 }
   0x5   :  { %p294_p1 = scmp.lt.u32.totalorder %s290_s22, %s552_s2 }
   0x7   :  { %p296_p2 = pnand %p294_p1, %p291_p0 }
   0x9   :  { %299 = shalt.err (!%p296_p2)
}
   0xa   :  { %s300_s27 = scalar_lea.vmem %s33_s19, 512  ;;  %p305_p4 = scmp.lt.s32.totalorder %s33_s19, %s33_s19 }
   0xb   :  { %p301_p3 = scmp.ne.s32.totalorder %s33_s19, %s300_s27  ;;  %p306_p5 = scmp.lt.s32.totalorder %s300_s27, %s300_s27 }
   0xd   :  { %p307_p6 = por %p306_p5, %p305_p4 }
   0xf   :  { %p308_p7 = pnand %p307_p6, %p301_p3 }
  0x11   :  { %311 = shalt.err (!%p308_p7)
}
  0x12   :  { %s409_s28 = smov 128   ;;  %s410_s29 = smov 8  }
  0x13   :  { %38 = dma.hbm_to_vmem [thread:$0]  %s552_s2, 512, %s33_s19, [#allocation8], %s409_s28, %s409_s28, %s410_s29  }
  0x14   :  { %s411_s7 = smov [#allocation4]   ;;  %s312_s11 = scalar_lea.hbm %s551_s1, 128 }
  0x15   :  { %s20_s8 = sshll.u32 %s411_s7, 4  ;;  %p313_p8 = scmp.ne.s32.totalorder %s551_s1, %s312_s11  ;;  %s21_s8 = int_to_ptr.vmem [resolvable:$true] %s20_s8 }
  0x16   :  { %p316_p9 = scmp.lt.u32.totalorder %s312_s11, %s551_s1 }
  0x18   :  { %p318_p10 = pnand %p316_p9, %p313_p8 }
  0x1a   :  { %321 = shalt.err (!%p318_p10)
}
  0x1b   :  { %s322_s16 = scalar_lea.vmem %s21_s8, 128  ;;  %p327_p12 = scmp.lt.s32.totalorder %s21_s8, %s21_s8 }
  0x1c   :  { %p323_p11 = scmp.ne.s32.totalorder %s21_s8, %s322_s16  ;;  %p328_p13 = scmp.lt.s32.totalorder %s322_s16, %s322_s16 }
  0x1e   :  { %p329_p0 = por %p328_p13, %p327_p12 }
  0x20   :  { %p330_p1 = pnand %p329_p0, %p323_p11 }
  0x22   :  { %333 = shalt.err (!%p330_p1)
}
  0x23   :  { %s412_s2 = smov 64   ;;  %s413_s17 = smov 4  }
  0x24   :  { %26 = dma.hbm_to_vmem [thread:$0]  %s551_s1, 128, %s21_s8, [#allocation5], %s412_s2, %s412_s2, %s413_s17  }
  0x25   :  { %s414_s20 = smov [#allocation9]   ;;  %s415_s22 = smov [#allocation10]  }
  0x26   :  { %s45_s21 = sshll.u32 %s414_s20, 4  ;;  %s54_s23 = sshll.u32 %s415_s22, 4  ;;  %s46_s21 = int_to_ptr.vmem [resolvable:$true] %s45_s21  ;;  %s479_s23 = int_to_ptr.vmem [resolvable:$true] %s54_s23 }
  0x27   :  { %s334_s26 = scalar_lea.hbm %s553_s3, 32 }
  0x28   :  { %p335_p2 = scmp.ne.s32.totalorder %s553_s3, %s334_s26  ;;  %p338_p3 = scmp.lt.u32.totalorder %s334_s26, %s553_s3 }
  0x2a   :  { %p340_p4 = pnand %p338_p3, %p335_p2 }
  0x2c   :  { %343 = shalt.err (!%p340_p4)
}
  0x2d   :  { %s344_s1 = scalar_lea.vmem %s46_s21, 32  ;;  %p349_p6 = scmp.lt.s32.totalorder %s46_s21, %s46_s21 }
  0x2e   :  { %p345_p5 = scmp.ne.s32.totalorder %s46_s21, %s344_s1  ;;  %p350_p7 = scmp.lt.s32.totalorder %s344_s1, %s344_s1 }
  0x30   :  { %p351_p8 = por %p350_p7, %p349_p6 }
  0x32   :  { %p352_p9 = pnand %p351_p8, %p345_p5 }
  0x34   :  { %355 = shalt.err (!%p352_p9)
}
  0x35   :  { %48 = dma.hbm_to_vmem [thread:$0]  %s553_s3, 32, %s46_s21, [#allocation8]  }
  0x36   :  { %s356_s12 = scalar_lea.hbm %s554_s4, 256 }
  0x37   :  { %p357_p10 = scmp.ne.s32.totalorder %s554_s4, %s356_s12  ;;  %p360_p11 = scmp.lt.u32.totalorder %s356_s12, %s554_s4 }
  0x39   :  { %p362_p12 = pnand %p360_p11, %p357_p10 }
  0x3b   :  { %365 = shalt.err (!%p362_p12)
}
  0x3c   :  { %s366_s2 = scalar_lea.vmem %s479_s23, 256  ;;  %p371_p0 = scmp.lt.s32.totalorder %s479_s23, %s479_s23 }
  0x3d   :  { %p367_p13 = scmp.ne.s32.totalorder %s479_s23, %s366_s2  ;;  %p372_p1 = scmp.lt.s32.totalorder %s366_s2, %s366_s2 }
  0x3f   :  { %p373_p2 = por %p372_p1, %p371_p0 }
  0x41   :  { %p374_p3 = pnand %p373_p2, %p367_p13 }
  0x43   :  { %377 = shalt.err (!%p374_p3)
}
  0x44   :  { %60 = dma.hbm_to_vmem [thread:$0]  %s554_s4, 256, %s479_s23, [#allocation11], %s409_s28, %s409_s28, %s410_s29  }
  0x45   :  { %400 = dma.done.wait [#allocation5], 128  }
  0x46   :  { %401 = vsyncadd [#allocation5], 4294967168 }
  0x47   :  { %402 = dma.done.wait [#allocation8], 544  }
  0x48   :  { %403 = vsyncadd [#allocation8], 4294966752 }
  0x49   :  { %404 = dma.done.wait [#allocation11], 256  }
  0x4a   :  { %405 = vsyncadd [#allocation11], 4294967040  ;;  %v416_v0 = vmov 0   ;;  %v166_v1 = vld [vmem:[#allocation10] sm:$0xff]  ;;  %v167_v2 = vld [vmem:[#allocation10 + $0x8] sm:$0xff]  ;;  %vm119_vm0 = vcmask 261120   ;;  %v84_v8 = vlaneseq }
  0x4b   :  { %155 = vmatprep.mubr.bf16.mxu0 %v416_v0  ;;  %v281_v3 = vld [vmem:[#allocation7 + $0x4] ss:$8 sps:$4 sm:$0xff]   ;;  %v283_v4 = vld [vmem:[#allocation7] ss:$8 sps:$4 sm:$0xff]   ;;  %v284_v5 = vld [vmem:[#allocation7 + $0x14] ss:$8 sps:$4 sm:$0xff]  }
  0x4c   :  { %123 = vmatprep.subr.bf16.mxu0 %v281_v3  ;;  %v286_v6 = vld [vmem:[#allocation7 + $0x10] ss:$8 sps:$4 sm:$0xff]   ;;  %v85_v9 = vshrl.u32 %v84_v8, 7  ;;  %v82_v11 = vld [vmem:[#allocation9] sm:$0x3]  ;;  %p262_p4 = scmp.lt.s32.totalorder %s550_s0, 256 }
  0x4d   :  { %124 = vmatpush1.bf16.msra.mxu0 %v283_v4  ;;  %v287_v7 = vld [vmem:[#allocation4] sm:$0xff]  }
  0x4e   :  { %125 = vmatprep.subr.bf16.mxu0 %v284_v5  ;;  %v86_v10 = vsub.s32 0, %v85_v9  ;;  %v90_v12 = vsub.s32 1, %v85_v9 }
  0x50   :  { %v87_v13 = vrot.slane %v82_v11, %v86_v10  ;;  %v91_v14 = vrot.slane %v82_v11, %v90_v12 }
  0x51   :  { %126 = vmatpush1.bf16.msra.mxu0 %v286_v6 }
  0x54   :  { %260 = vmatmul.mubr.msk.bf16.vlgmr.msra.gmra.mrb[0].mxu0 %vm119_vm0, %v287_v7 }
 0x125   :  { %172 = sbr.rel (%p262_p4) target bundleno = 302 (0x12e), region = 37 }
 0x127   :  { %v157_v15 = vpop.f32.mrb[0].mxu0 }
 0x128   :  { %v158_v16 = vadd.f32 %v157_v15, %v87_v13  ;;  %v159_v17 = vpop.f32.mrb[1].mxu0 }
 0x129   :  { %v160_v18 = vadd.f32 %v159_v17, %v91_v14  ;;  %v161_v19 = vpop.f32.mrb[2].mxu0 }
 0x12a   :  { %v162_v20 = vadd.f32 %v161_v19, %v87_v13  ;;  %v163_v21 = vpop.f32.mrb[3].mxu0  ;;  %173 = vst [vmem:[#allocation12] sm:$0xff] (!%p262_p4), %v158_v16 }
 0x12b   :  { %v164_v22 = vadd.f32 %v163_v21, %v91_v14  ;;  %174 = vst [vmem:[#allocation12 + $0x8] sm:$0xff] (!%p262_p4), %v160_v18 }
 0x12c   :  { %175 = vst [vmem:[#allocation12 + $0x10] sm:$0xff] %v162_v20 }
 0x12d   :  { %176 = vst [vmem:[#allocation12 + $0x18] sm:$0xff] %v164_v22 }
 0x12e PF:  { %p264_p5 = scmp.gt.s32.totalorder %s550_s0, 0 }
 0x12f   :  { %v417_v23 = vmov (!%p264_p5), 0  }
 0x130   :  { %180 = sbr.rel (%p264_p5) target bundleno = 440 (0x1b8), region = 41  ;;  %288 = vset.pattern.permute.xlu0 (!%p264_p5), %v417_v23 }
 0x131   :  { %183 = vperm.xlu0 (!%p264_p5), %288, %v166_v1  }
 0x135   :  { %188 = vperm.xlu0 (!%p264_p5), %288, %v167_v2  }
 0x1b0   :  { %v184_v24 = vpop.permute.xlu0 %183 }
 0x1b1   :  { %v191_v25 = vmul.f32 %v184_v24, %v158_v16  ;;  %v192_v26 = vmul.f32 %v184_v24, %v160_v18 }
 0x1b3   :  { %195 = vst [vmem:[#allocation12] sm:$0xff] %v191_v25  ;;  %196 = vst [vmem:[#allocation12 + $0x8] sm:$0xff] %v192_v26 }
 0x1b4   :  { %v189_v27 = vpop.permute.xlu0 %188 }
 0x1b5   :  { %v193_v28 = vmul.f32 %v189_v27, %v162_v20  ;;  %v194_v29 = vmul.f32 %v189_v27, %v164_v22 }
 0x1b7   :  { %197 = vst [vmem:[#allocation12 + $0x10] sm:$0xff] %v193_v28  ;;  %198 = vst [vmem:[#allocation12 + $0x18] sm:$0xff] %v194_v29 }
 0x1b8 PF:  { %p201_p6 = pnand %p264_p5, %p262_p4 }
 0x1b9   :  { %v418_v30 = vmov (!%p201_p6), 0   ;;  %v206_v31 = vand.u32 (!%p201_p6), 127, %v84_v8  ;;  %v211_v33 = vstv (!%p201_p6), %s550_s0 }
 0x1ba   :  { %204 = sbr.rel (%p201_p6) target bundleno = 579 (0x243), region = 45  ;;  %289 = vset.pattern.permute.xlu0 (!%p201_p6), %v418_v30 }
 0x1bb   :  { %216 = vperm.xlu0 (!%p201_p6), %289, %v166_v1   ;;  %v207_v32 = vadd.s32 (!%p201_p6), 128, %v206_v31  ;;  %vm212_vm1 = vcmp.ge.s32.totalorder (!%p201_p6), %v206_v31, %v211_v33 }
 0x1bd   :  { %vm213_vm2 = vcmp.ge.s32.totalorder (!%p201_p6), %v207_v32, %v211_v33 }
 0x1bf   :  { %221 = vperm.xlu0 (!%p201_p6), %289, %v167_v2  }
 0x23a   :  { %v217_v34 = vpop.permute.xlu0 %216 }
 0x23b   :  { %v224_v35 = vsel %vm212_vm1, %v217_v34, 1.0  ;;  %v225_v36 = vsel %vm213_vm2, %v217_v34, 1.0 }
 0x23c   :  { %v228_v37 = vmul.f32 %v224_v35, %v158_v16  ;;  %v229_v38 = vmul.f32 %v225_v36, %v160_v18 }
 0x23e   :  { %v222_v39 = vpop.permute.xlu0 %221  ;;  %232 = vst [vmem:[#allocation12] sm:$0xff] %v228_v37  ;;  %233 = vst [vmem:[#allocation12 + $0x8] sm:$0xff] %v229_v38 }
 0x23f   :  { %v226_v40 = vsel %vm212_vm1, %v222_v39, 1.0  ;;  %v227_v41 = vsel %vm213_vm2, %v222_v39, 1.0 }
 0x240   :  { %v230_v42 = vmul.f32 %v226_v40, %v162_v20  ;;  %v231_v43 = vmul.f32 %v227_v41, %v164_v22 }
 0x242   :  { %234 = vst [vmem:[#allocation12 + $0x10] sm:$0xff] %v230_v42  ;;  %235 = vst [vmem:[#allocation12 + $0x18] sm:$0xff] %v231_v43 }
 0x243 PF:  { %s419_s6 = smov [#allocation12]  }
 0x244   :  { %s241_s7 = sshll.u32 %s419_s6, 4  ;;  %s242_s7 = int_to_ptr.vmem [resolvable:$true] %s241_s7 }
 0x245   :  { %s378_s0 = scalar_lea.vmem %s242_s7, 512  ;;  %p383_p8 = scmp.lt.s32.totalorder %s242_s7, %s242_s7 }
 0x246   :  { %p379_p7 = scmp.ne.s32.totalorder %s242_s7, %s378_s0  ;;  %p384_p9 = scmp.lt.s32.totalorder %s378_s0, %s378_s0 }
 0x248   :  { %p385_p10 = por %p384_p9, %p383_p8 }
 0x24a   :  { %p386_p11 = pnand %p385_p10, %p379_p7 }
 0x24c   :  { %389 = shalt.err (!%p386_p11)
}
 0x24d   :  { %s390_s9 = scalar_lea.hbm %s555_s5, 512 }
 0x24e   :  { %p391_p12 = scmp.ne.s32.totalorder %s555_s5, %s390_s9  ;;  %p394_p13 = scmp.lt.u32.totalorder %s390_s9, %s555_s5 }
 0x250   :  { %p396_p0 = pnand %p394_p13, %p391_p12 }
 0x252   :  { %399 = shalt.err (!%p396_p0)
}
 0x253   :  { %s420_s14 = smov 256   ;;  %s421_s15 = smov 16  }
 0x254   :  { %247 = dma.vmem_to_hbm [thread:$0]  %s242_s7, 512, %s555_s5, [#allocation6], %s420_s14, %s420_s14, %s421_s15  }
 0x255   :  { %406 = dma.done.wait [#allocation6], 512  }
 0x256   :  { %407 = vsyncadd [#allocation6], 4294966784 }
 0x257   :  { %251 = vsyncpa [#allocation5], 1 }
 0x258   :  { %252 = vsyncpa [#allocation8], 1 }
 0x259   :  { %253 = vsyncpa [#allocation11], 1 }
 0x25a   :  { %254 = vsyncpa [#allocation6], 1 }

</bundles_post_ra>
